<compile_context>
chip_gen: v6e
topology: v6e:2x2x1
jax: 0.10.0
libtpu: 0.0.40
codegen_flags: <defaults>
</compile_context>

<pallas_src>
import functools

import jax
import jax.numpy as jnp
from jax.experimental import pallas as pl
from jax.experimental.pallas import tpu as pltpu

SUBLANE = 8  # f32 sublane multiple; every HBM-streamed block here is f32.


def _round_up(n, m):
    return ((n + m - 1) // m) * m


def mlp_kernel(x_ref, w1_ref, b1_ref, w2_ref, b2_ref, w3_ref, b3_ref,
               w4_ref, b4_ref, o_ref):
    # bf16 operands into the MXU, f32 accumulation (preferred_element_type).
    x = x_ref[...].astype(jnp.bfloat16)
    h = jnp.dot(x, w1_ref[...], preferred_element_type=jnp.float32)
    # Intermediate bias-add + ReLU in bf16 (halves VALU slot pressure on
    # v6e/v7x; the bf16 cast was happening anyway for the next MXU push).
    h = jnp.maximum(h.astype(jnp.bfloat16) + b1_ref[...], 0)
    h = jnp.dot(h, w2_ref[...], preferred_element_type=jnp.float32)
    h = jnp.maximum(h.astype(jnp.bfloat16) + b2_ref[...], 0)
    h = jnp.dot(h, w3_ref[...], preferred_element_type=jnp.float32)
    h = jnp.maximum(h.astype(jnp.bfloat16) + b3_ref[...], 0)
    h = jnp.dot(h, w4_ref[...], preferred_element_type=jnp.float32)
    # Final layer: f32 bias add on the f32 accumulator, f32 narrow store.
    o_ref[...] = (h + b4_ref[...]).astype(o_ref.dtype)


def prepare_params(params):
    """One-time param prep (do NOT call per forward).

    params: ((w1,b1),(w2,b2),(w3,b3),(w4,b4)); w is [in, out] (transpose of
    PyTorch's [out, in]), b is [out], all float32.
    Returns a flat tuple with bf16 weights, bf16 [1,N] biases for layers 1-3
    and an f32 [1,N] bias for the final layer.
    """
    (w1, b1), (w2, b2), (w3, b3), (w4, b4) = params
    bf = jnp.bfloat16
    return (
        w1.astype(bf), b1.reshape(1, -1).astype(bf),
        w2.astype(bf), b2.reshape(1, -1).astype(bf),
        w3.astype(bf), b3.reshape(1, -1).astype(bf),
        w4.astype(bf), b4.reshape(1, -1).astype(jnp.float32),
    )


@functools.partial(jax.jit, static_argnames=("block_b",))
def improved_nn_forward(x, prepared, block_b=None):
    """Forward pass of ImprovedNN.

    x:        [B, input_dim] float32 (streamed unpadded).
    prepared: output of prepare_params().
    block_b:  batch tile. None (default) auto-sizes to ~8 grid steps capped at
              4096 rows; VMEM is not the binding resource even on v7x (64 MiB),
              the goal is just to amortize per-step overhead while keeping >=2
              steps so DMA pipelines and the parallel axis shards across TCs.
    """
    w1, b1, w2, b2, w3, b3, w4, b4 = prepared
    B, d_in = x.shape
    d_out = w4.shape[1]

    if block_b is None:
        eff_bb = min(4096, max(SUBLANE, _round_up(pl.cdiv(B, 8), SUBLANE)))
    else:
        eff_bb = max(SUBLANE,
                     min(_round_up(block_b, SUBLANE), _round_up(B, SUBLANE)))
    grid = (pl.cdiv(B, eff_bb),)

    def stream(cols):
        # Batch-streamed arrays: last dim equals the full array dim (legal
        # BlockSpec even when < 128 lanes).
        return pl.BlockSpec((eff_bb, cols), lambda i: (i, 0))

    def resident(a):
        # Weights/biases: same whole-array block every step -> stay in VMEM.
        return pl.BlockSpec(a.shape, lambda i: (0, 0))

    h1, h2, h3 = w1.shape[1], w2.shape[1], w3.shape[1]
    flops = 2 * B * (d_in * h1 + h1 * h2 + h2 * h3 + h3 * d_out)
    bytes_accessed = (
        x.size * x.dtype.itemsize
        + sum(a.size * a.dtype.itemsize
              for a in (w1, b1, w2, b2, w3, b3, w4, b4))
        + B * d_out * 4)

    return pl.pallas_call(
        mlp_kernel,
        out_shape=jax.ShapeDtypeStruct((B, d_out), jnp.float32),
        grid_spec=pltpu.PrefetchScalarGridSpec(
            num_scalar_prefetch=0,
            grid=grid,
            in_specs=[
                stream(d_in),
                resident(w1), resident(b1),
                resident(w2), resident(b2),
                resident(w3), resident(b3),
                resident(w4), resident(b4),
            ],
            out_specs=stream(d_out),
        ),
        compiler_params=pltpu.CompilerParams(
            dimension_semantics=("parallel",),
            vmem_limit_bytes=48 * 1024 * 1024,
        ),
        cost_estimate=pl.CostEstimate(
            flops=flops, transcendentals=0, bytes_accessed=bytes_accessed),
    )(x, w1, b1, w2, b2, w3, b3, w4, b4)


def init_linear(key, fan_in, fan_out):
    # Deterministic init mimicking torch.nn.Linear default (uniform +-1/sqrt(fan_in)).
    kw, kb = jax.random.split(key)
    bound = 1.0 / jnp.sqrt(fan_in)
    w = jax.random.uniform(kw, (fan_in, fan_out), jnp.float32, -bound, bound)
    b = jax.random.uniform(kb, (fan_out,), jnp.float32, -bound, bound)
    return w, b


if __name__ == "__main__":
    key = jax.random.PRNGKey(0)
    k_x, k1, k2, k3, k4 = jax.random.split(key, 5)

    input_dim, output_dim = 32, 10
    batch = 16

    params = (
        init_linear(k1, input_dim, 256),
        init_linear(k2, 256, 128),
        init_linear(k3, 128, 64),
        init_linear(k4, 64, output_dim),
    )
    prepared = prepare_params(params)

    x = jax.random.normal(k_x, (batch, input_dim), jnp.float32)

    # Tiny test batch: block_b=8 -> 2 grid steps (exercises the pipeline /
    # megacore path). Use block_b=None (auto) for real batch sizes.
    out = improved_nn_forward(x, prepared, block_b=8)
    jax.block_until_ready(out)

    # Reference in plain f32 JAX (same math, same params).
    def ref(x, params):
        (w1, b1), (w2, b2), (w3, b3), (w4, b4) = params
        h = jnp.maximum(x @ w1 + b1, 0.0)
        h = jnp.maximum(h @ w2 + b2, 0.0)
        h = jnp.maximum(h @ w3 + b3, 0.0)
        return h @ w4 + b4

    expected = ref(x, params)
    assert out.shape == (batch, output_dim)
    # bf16 weights/activations with f32 MXU accumulation vs f32 reference ->
    # loosened tolerance.
    assert jnp.allclose(out, expected, atol=5e-2, rtol=5e-2), float(
        jnp.max(jnp.abs(out - expected)))
    print("KERNEL_OK")
</pallas_src>

<mosaic_0001>
module attributes {stable_mosaic.version = 11 : i64} {
  func.func @mlp_kernel(%arg0: i32, %arg1: memref<8x32xf32, #tpu.memory_space<vmem>>, %arg2: memref<32x256xbf16, #tpu.memory_space<vmem>>, %arg3: memref<1x256xbf16, #tpu.memory_space<vmem>>, %arg4: memref<256x128xbf16, #tpu.memory_space<vmem>>, %arg5: memref<1x128xbf16, #tpu.memory_space<vmem>>, %arg6: memref<128x64xbf16, #tpu.memory_space<vmem>>, %arg7: memref<1x64xbf16, #tpu.memory_space<vmem>>, %arg8: memref<64x10xbf16, #tpu.memory_space<vmem>>, %arg9: memref<1x10xf32, #tpu.memory_space<vmem>>, %arg10: memref<8x10xf32, #tpu.memory_space<vmem>>) attributes {dimension_semantics = [#tpu.dimension_semantics<parallel>], iteration_bounds = array<i64: 2>, scalar_prefetch = 0 : i64, scratch_operands = 0 : i64, tpu.core_type = #tpu.core_type<tc>, window_params = [{transform_indices = @transform_0, window_bounds = array<i64: 8, 32>}, {pipeline_mode = #tpu.pipeline_mode<synchronous>, transform_indices = @transform_1, window_bounds = array<i64: 32, 256>}, {pipeline_mode = #tpu.pipeline_mode<synchronous>, transform_indices = @transform_2, window_bounds = array<i64: 1, 256>}, {pipeline_mode = #tpu.pipeline_mode<synchronous>, transform_indices = @transform_3, window_bounds = array<i64: 256, 128>}, {pipeline_mode = #tpu.pipeline_mode<synchronous>, transform_indices = @transform_4, window_bounds = array<i64: 1, 128>}, {pipeline_mode = #tpu.pipeline_mode<synchronous>, transform_indices = @transform_5, window_bounds = array<i64: 128, 64>}, {pipeline_mode = #tpu.pipeline_mode<synchronous>, transform_indices = @transform_6, window_bounds = array<i64: 1, 64>}, {pipeline_mode = #tpu.pipeline_mode<synchronous>, transform_indices = @transform_7, window_bounds = array<i64: 64, 10>}, {pipeline_mode = #tpu.pipeline_mode<synchronous>, transform_indices = @transform_8, window_bounds = array<i64: 1, 10>}, {transform_indices = @transform_9, window_bounds = array<i64: 8, 10>}]} {
    %c0 = arith.constant 0 : index
    %c0_0 = arith.constant 0 : index
    %0 = vector.load %arg1[%c0, %c0_0] : memref<8x32xf32, #tpu.memory_space<vmem>>, vector<8x32xf32>
    %1 = arith.truncf %0 : vector<8x32xf32> to vector<8x32xbf16>
    %c0_1 = arith.constant 0 : index
    %c0_2 = arith.constant 0 : index
    %2 = vector.load %arg2[%c0_1, %c0_2] : memref<32x256xbf16, #tpu.memory_space<vmem>>, vector<32x256xbf16>
    %cst = arith.constant dense<0.000000e+00> : vector<8x256xf32>
    %3 = tpu.matmul %1, %2, %cst {dimension_numbers = #tpu.dot_dimension_numbers<[1], [0], [0], [1], [0, 0, 1, 1], [], []>} : vector<8x32xbf16>, vector<32x256xbf16>, vector<8x256xf32> -> vector<8x256xf32>
    %4 = arith.truncf %3 : vector<8x256xf32> to vector<8x256xbf16>
    %c0_3 = arith.constant 0 : index
    %c0_4 = arith.constant 0 : index
    %5 = vector.load %arg3[%c0_3, %c0_4] : memref<1x256xbf16, #tpu.memory_space<vmem>>, vector<1x256xbf16>
    %6 = vector.broadcast %5 : vector<1x256xbf16> to vector<8x256xbf16>
    %7 = arith.addf %4, %6 : vector<8x256xbf16>
    %cst_5 = arith.constant 0.000000e+00 : bf16
    %8 = vector.broadcast %cst_5 : bf16 to vector<8x256xbf16>
    %9 = arith.maximumf %7, %8 : vector<8x256xbf16>
    %c0_6 = arith.constant 0 : index
    %c0_7 = arith.constant 0 : index
    %10 = vector.load %arg4[%c0_6, %c0_7] : memref<256x128xbf16, #tpu.memory_space<vmem>>, vector<256x128xbf16>
    %cst_8 = arith.constant dense<0.000000e+00> : vector<8x128xf32>
    %11 = tpu.matmul %9, %10, %cst_8 {dimension_numbers = #tpu.dot_dimension_numbers<[1], [0], [0], [1], [0, 0, 1, 1], [], []>} : vector<8x256xbf16>, vector<256x128xbf16>, vector<8x128xf32> -> vector<8x128xf32>
    %12 = arith.truncf %11 : vector<8x128xf32> to vector<8x128xbf16>
    %c0_9 = arith.constant 0 : index
    %c0_10 = arith.constant 0 : index
    %13 = vector.load %arg5[%c0_9, %c0_10] : memref<1x128xbf16, #tpu.memory_space<vmem>>, vector<1x128xbf16>
    %14 = vector.broadcast %13 : vector<1x128xbf16> to vector<8x128xbf16>
    %15 = arith.addf %12, %14 : vector<8x128xbf16>
    %cst_11 = arith.constant 0.000000e+00 : bf16
    %16 = vector.broadcast %cst_11 : bf16 to vector<8x128xbf16>
    %17 = arith.maximumf %15, %16 : vector<8x128xbf16>
    %c0_12 = arith.constant 0 : index
    %c0_13 = arith.constant 0 : index
    %18 = vector.load %arg6[%c0_12, %c0_13] : memref<128x64xbf16, #tpu.memory_space<vmem>>, vector<128x64xbf16>
    %cst_14 = arith.constant dense<0.000000e+00> : vector<8x64xf32>
    %19 = tpu.matmul %17, %18, %cst_14 {dimension_numbers = #tpu.dot_dimension_numbers<[1], [0], [0], [1], [0, 0, 1, 1], [], []>} : vector<8x128xbf16>, vector<128x64xbf16>, vector<8x64xf32> -> vector<8x64xf32>
    %20 = arith.truncf %19 : vector<8x64xf32> to vector<8x64xbf16>
    %c0_15 = arith.constant 0 : index
    %c0_16 = arith.constant 0 : index
    %21 = vector.load %arg7[%c0_15, %c0_16] : memref<1x64xbf16, #tpu.memory_space<vmem>>, vector<1x64xbf16>
    %22 = vector.broadcast %21 : vector<1x64xbf16> to vector<8x64xbf16>
    %23 = arith.addf %20, %22 : vector<8x64xbf16>
    %cst_17 = arith.constant 0.000000e+00 : bf16
    %24 = vector.broadcast %cst_17 : bf16 to vector<8x64xbf16>
    %25 = arith.maximumf %23, %24 : vector<8x64xbf16>
    %c0_18 = arith.constant 0 : index
    %c0_19 = arith.constant 0 : index
    %26 = vector.load %arg8[%c0_18, %c0_19] : memref<64x10xbf16, #tpu.memory_space<vmem>>, vector<64x10xbf16>
    %cst_20 = arith.constant dense<0.000000e+00> : vector<8x10xf32>
    %27 = tpu.matmul %25, %26, %cst_20 {dimension_numbers = #tpu.dot_dimension_numbers<[1], [0], [0], [1], [0, 0, 1, 1], [], []>} : vector<8x64xbf16>, vector<64x10xbf16>, vector<8x10xf32> -> vector<8x10xf32>
    %c0_21 = arith.constant 0 : index
    %c0_22 = arith.constant 0 : index
    %28 = vector.load %arg9[%c0_21, %c0_22] : memref<1x10xf32, #tpu.memory_space<vmem>>, vector<1x10xf32>
    %29 = vector.broadcast %28 : vector<1x10xf32> to vector<8x10xf32>
    %30 = arith.addf %27, %29 : vector<8x10xf32>
    %c0_23 = arith.constant 0 : index
    %c0_24 = arith.constant 0 : index
    %31 = vector.load %arg10[%c0_23, %c0_24] : memref<8x10xf32, #tpu.memory_space<vmem>>, vector<8x10xf32>
    tpu.vector_store %arg10[%c0_23, %c0_24], %30 {strides = array<i32>} : memref<8x10xf32, #tpu.memory_space<vmem>>, vector<8x10xf32>,
    return
  }
  func.func @transform_0(%arg0: i32) -> (i32, i32) {
    %c0_i32 = arith.constant 0 : i32
    %c0_i32_0 = arith.constant 0 : i32
    return %arg0, %c0_i32 : i32, i32
  }
  func.func @transform_1(%arg0: i32) -> (i32, i32) {
    %c0_i32 = arith.constant 0 : i32
    %c0_i32_0 = arith.constant 0 : i32
    %c0_i32_1 = arith.constant 0 : i32
    return %c0_i32, %c0_i32_0 : i32, i32
  }
  func.func @transform_2(%arg0: i32) -> (i32, i32) {
    %c0_i32 = arith.constant 0 : i32
    %c0_i32_0 = arith.constant 0 : i32
    %c0_i32_1 = arith.constant 0 : i32
    return %c0_i32, %c0_i32_0 : i32, i32
  }
  func.func @transform_3(%arg0: i32) -> (i32, i32) {
    %c0_i32 = arith.constant 0 : i32
    %c0_i32_0 = arith.constant 0 : i32
    %c0_i32_1 = arith.constant 0 : i32
    return %c0_i32, %c0_i32_0 : i32, i32
  }
  func.func @transform_4(%arg0: i32) -> (i32, i32) {
    %c0_i32 = arith.constant 0 : i32
    %c0_i32_0 = arith.constant 0 : i32
    %c0_i32_1 = arith.constant 0 : i32
    return %c0_i32, %c0_i32_0 : i32, i32
  }
  func.func @transform_5(%arg0: i32) -> (i32, i32) {
    %c0_i32 = arith.constant 0 : i32
    %c0_i32_0 = arith.constant 0 : i32
    %c0_i32_1 = arith.constant 0 : i32
    return %c0_i32, %c0_i32_0 : i32, i32
  }
  func.func @transform_6(%arg0: i32) -> (i32, i32) {
    %c0_i32 = arith.constant 0 : i32
    %c0_i32_0 = arith.constant 0 : i32
    %c0_i32_1 = arith.constant 0 : i32
    return %c0_i32, %c0_i32_0 : i32, i32
  }
  func.func @transform_7(%arg0: i32) -> (i32, i32) {
    %c0_i32 = arith.constant 0 : i32
    %c0_i32_0 = arith.constant 0 : i32
    %c0_i32_1 = arith.constant 0 : i32
    return %c0_i32, %c0_i32_0 : i32, i32
  }
  func.func @transform_8(%arg0: i32) -> (i32, i32) {
    %c0_i32 = arith.constant 0 : i32
    %c0_i32_0 = arith.constant 0 : i32
    %c0_i32_1 = arith.constant 0 : i32
    return %c0_i32, %c0_i32_0 : i32, i32
  }
  func.func @transform_9(%arg0: i32) -> (i32, i32) {
    %c0_i32 = arith.constant 0 : i32
    %c0_i32_0 = arith.constant 0 : i32
    return %arg0, %c0_i32 : i32, i32
  }
}

</mosaic_0001>

<bundles_post_ra>
// kernel: improved_nn_forward.1
= control target key start
LH: loop header
LB: loop body
LE: loop exit
PB: predicated region body
PF: predicated region fallthrough
CT: control target
= control target key end

     0   :  { %s1635_s0 = inlined_call_operand.hbm [shape: f32[16,32], index: 0, kind: input, shape index: {}]   ;;  %s1636_s1 = inlined_call_operand.hbm [shape: bf16[32,256], index: 1, kind: input, shape index: {}]   ;;  %s1637_s2 = inlined_call_operand.vmem [shape: bf16[1,256], index: 2, kind: input, shape index: {}]   ;;  %s1638_s3 = inlined_call_operand.vmem [shape: bf16[256,128], index: 3, kind: input, shape index: {}]   ;;  %s1639_s4 = inlined_call_operand.vmem [shape: bf16[1,128], index: 4, kind: input, shape index: {}]   ;;  %s1640_s5 = inlined_call_operand.vmem [shape: bf16[128,64], index: 5, kind: input, shape index: {}]   ;;  %s1641_s6 = inlined_call_operand.vmem [shape: bf16[1,64], index: 6, kind: input, shape index: {}]   ;;  %s1642_s7 = inlined_call_operand.vmem [shape: bf16[64,10], index: 7, kind: input, shape index: {}]   ;;  %s1643_s8 = inlined_call_operand.vmem [shape: f32[1,10], index: 8, kind: input, shape index: {}]   ;;  %s1644_s9 = inlined_call_operand.hbm [shape: f32[16,10], index: 9, kind: output, shape index: {}]  }
   0x1   :  { %1652 = sst [smem:[#allocation14_spill]] %s1636_s1 }
   0x2   :  { %14 = vsyncpa [#allocation3], 0 }
   0x3   :  { %16 = vsyncpa [#allocation3 + $0x1], 0 }
   0x4   :  { %17 = vsyncpa [#allocation6], 0 }
   0x5   :  { %18 = vsyncpa [#allocation4], 0 }
   0x6   :  { %20 = vsyncpa [#allocation4 + $0x1], 0  ;;  %s1350_s30 = smov 0   ;;  %s1352_s10 = smov 0  }
   0x7   :  { %s1354_s11 = smov 0   ;;  %s1356_s12 = smov 0  }
   0x8 LB: > { %s1371_s13 = sadd.s32 4294967295, %s1289_s12   ;;  %s952_s14 = sadd.s32 4294967294, %s1289_s12   ;;  %s1289_s12 = sphi %s1356_s12, %s1672_s12   ;;  %s1285_s11 = sphi %s1354_s11, %s1676_s11   ;;  %s1281_s10 = sphi %s1352_s10, %s1675_s10   ;;  %s1277_s30 = sphi %s1350_s30, %s1674_s30  }
   0x9   : > { %p46_p0 = scmp.ne.s32.totalorder %s1281_s10, %s1277_s30  ;;  %p1648_p1 = scmp.eq.s32.totalorder %s1371_s13, 0 }
   0xa   : > { %p244_p3 = scmp.eq.s32.totalorder %s952_s14, 1  ;;  %p953_p5 = scmp.ge.s32.totalorder %s1289_s12, 1 }
   0xb   : > { %p1380_p4 = por %p1648_p1, %p46_p0  ;;  %p251_p7 = scmp.lt.s32.totalorder %s1289_s12, 3 }
   0xc   : > { %p1385_p6 = por %p244_p3, %p46_p0  ;;  %s1291_s18 = smov [#allocation5]  }
   0xd   : > { %s1653_s15 = scalar_select %p1380_p4, 1, 0 }
   0xe   : > { %s1654_s16 = scalar_select %p1385_p6, 1, 0 }
   0xf   : > { %p1390_p8 = pnand %p953_p5, %p251_p7  ;;  %s263_s19 = sshll.u32 %s1291_s18, 4  ;;  %s264_s19 = int_to_ptr.vmem [resolvable:$true] %s263_s19 }
  0x10   : > { %1655 = sst [smem:[#allocation11_spill]] %s1654_s16  ;;  %s1404_s21 = sadd.s32 1, %s1289_s12  }
  0x11   : > { %s1656_s17 = scalar_select %p1390_p8, 1, 0 }
  0x12   : > { %p1078_p9 = pneg %p1390_p8  ;;  %1658 = sst [smem:[#allocation12_spill]] %s1404_s21 }
  0x13   : > { %s33_s22 = sadd.s32 1, %s1285_s11  ;;  %s30_s23 = ssub.s32 %s1289_s12, %s1404_s21 }
  0x14   : > { %p1399_p11 = pnand %p1078_p9, %p1648_p1  ;;  %s1178_s24 = scalar_lea.vmem %s264_s19, 512 }
  0x15   : > { %p1179_p13 = scmp.ne.s32.totalorder %s264_s19, %s1178_s24  ;;  %p1186_p5 = scmp.lt.s32.totalorder %s264_s19, %s264_s19 }
  0x16   : > { %p1169_p12 = pneg %p1399_p11  ;;  %p1187_p7 = scmp.lt.s32.totalorder %s1178_s24, %s1178_s24 }
  0x18   : > { %p1181_p0 = pnand %p1179_p13, %p1169_p12  ;;  %p1188_p10 = por %p1187_p7, %p1186_p5 }
  0x1a   : > { %p1182_p3 = pneg %p1181_p0 }
  0x1c   : > { %p1189_p2 = pnand %p1188_p10, %p1182_p3 }
  0x1e   : > { %1192 = shalt.err (!%p1189_p2)
}
  0x1f   : > { %s1292_s25 = smov 128   ;;  %s1293_s26 = smov 8  }
  0x20   : > { %s1659_s1 = sld [smem:[#allocation14_spill]]  ;;  %p31_p9 = scmp.eq.s32.totalorder %s30_s23, 0 }
  0x21   : > { %p40_p12 = scmp.ne.s32.totalorder %s1285_s11, %s1281_s10  ;;  %p41_p10 = scmp.eq.s32.totalorder %s1289_s12, 0 }
  0x22   : > { %p1091_p2 = scmp.lt.s32.totalorder %s1289_s12, 2  ;;  %p1661_p0 = scmp.eq.s32.totalorder %s1371_s13, 1 }
  0x23   : > { %s1421_s29 = scalar_select %p31_p9, %s1285_s11, %s33_s22  }
  0x24   : > { %p42_p13 = por %p41_p10, %p40_p12  ;;  %p1425_p3 = por %p1661_p0, %p40_p12 }
  0x25   : > { %1660 = sst [smem:[#allocation13_spill]] %s1421_s29  ;;  %s298_s18 = sand.u32 1, %s1285_s11  }
  0x26   : > { %1081 = dma.hbm_to_vmem [thread:$0]  (!%p1399_p11), %s1659_s1, 512, %s264_s19, [#allocation6], %s1292_s25, %s1292_s25, %s1293_s26  }
  0x27   : > { %s1662_s14 = scalar_select %p1425_p3, 1, 0 }
  0x28   : > { %s957_s24 = sshll.u32 %s1289_s12, 7  ;;  %s956_s21 = sshll.u32 %s298_s18, 3 }
  0x29   : > { %s1434_s27 = scalar_lea.hbm %s1635_s0, %s957_s24  ;;  %s302_s19 = scalar_lea.vmem [#allocation2], %s956_s21 }
  0x2a   : > { %s309_s22 = sshll.u32 %s302_s19, 4  ;;  %p1436_p11 = pnand %p1091_p2, %p42_p13  ;;  %s310_s22 = int_to_ptr.vmem [resolvable:$true] %s309_s22 }
  0x2b   : > { %s299_s25 = scalar_lea.sflag [#allocation3], %s298_s18  ;;  %s1193_s26 = scalar_lea.hbm %s1434_s27, 128 }
  0x2c   : > { %p1194_p5 = scmp.ne.s32.totalorder %s1434_s27, %s1193_s26  ;;  %p1195_p7 = pneg %p1436_p11 }
  0x2d   : > { %s1198_s24 = scalar_lea.hbm %s1635_s0, 256  ;;  %p1199_p10 = scmp.lt.s32.totalorder %s1434_s27, %s1635_s0 }
  0x2e   : > { %p1196_p9 = pnand %p1195_p7, %p1194_p5  ;;  %p1200_p2 = scmp.lt.s32.totalorder %s1198_s24, %s1193_s26 }
  0x30   : > { %p1197_p12 = pneg %p1196_p9  ;;  %p1201_p13 = por %p1200_p2, %p1199_p10 }
  0x32   : > { %p1202_p0 = pnand %p1201_p13, %p1197_p12 }
  0x34   : > { %1205 = shalt.err (!%p1202_p0)
}
  0x35   : > { %s1206_s19 = scalar_lea.vmem %s310_s22, 128  ;;  %s1294_s18 = smov [#allocation2]  }
  0x36   : > { %p1207_p1 = scmp.ne.s32.totalorder %s310_s22, %s1206_s19  ;;  %s1211_s1 = sshll.u32 %s1294_s18, 4  ;;  %s1212_s1 = int_to_ptr.vmem [resolvable:$false] %s1211_s1 }
  0x37   : > { %s1213_s29 = scalar_lea.vmem %s1212_s1, 256  ;;  %p1214_p5 = scmp.lt.s32.totalorder %s310_s22, %s1212_s1 }
  0x38   : > { %p1209_p6 = pnand %p1207_p1, %p1195_p7  ;;  %p1215_p9 = scmp.lt.s32.totalorder %s1213_s29, %s1206_s19 }
  0x3a   : > { %p1210_p3 = pneg %p1209_p6  ;;  %p1216_p4 = por %p1215_p9, %p1214_p5 }
  0x3c   : > { %p1217_p8 = pnand %p1216_p4, %p1210_p3 }
  0x3e   : > { %1220 = shalt.err (!%p1217_p8)
}
  0x3f   : > { %1085 = dma.hbm_to_vmem [thread:$0]  (!%p1436_p11), %s1434_s27, 128, %s310_s22, %s299_s25  }
  0x40   : > { %p1664_p12 = scmp.ne.s32.totalorder %s1656_s17, 0 }
  0x41   : > { %s1457_s26 = sand.u32 (!%p1664_p12), 1, %s1281_s10   ;;  %p1665_p1 = scmp.ne.s32.totalorder (!%p1664_p12), %s1653_s15, 0 }
  0x42   : > { %318 = sbr.rel (%p1664_p12) target bundleno = 897 (0x381), region = 56  ;;  %s959_s16 = sshll.u32 (!%p1664_p12), %s1457_s26, 3 }
  0x43   : > { %s321_s1 = scalar_lea.sflag (!%p1664_p12), [#allocation3], %s1457_s26  ;;  %s324_s29 = scalar_lea.vmem (!%p1664_p12), [#allocation2], %s959_s16 }
  0x47   : > { %1264 = dma.done.wait (%p1665_p1), %s321_s1, 128  }
  0x48   : > { %1266 = vsyncadd (%p1665_p1), %s321_s1, 4294967168  ;;  %p1666_p4 = scmp.eq.s32.totalorder %s1371_s13, 0 }
  0x4a   : > { %1268 = dma.done.wait (%p1666_p4), [#allocation6], 512   ;;  %p1667_p6 = pmov %p1666_p4 }
  0x4b   : > { %v1295_v0 = vmov 0   ;;  %v1133_v1 = vld [vmem:[#allocation5 + $0x14] ss:$8 sps:$4 sm:$0xff]   ;;  %v1135_v2 = vld [vmem:[#allocation5 + $0x10] ss:$8 sps:$4 sm:$0xff]   ;;  %v1139_v6 = vld [vmem:[%s1638_s3 + $0x78] sm:$0xff]   ;;  %v450_v31 = vlaneseq }
  0x4c   : > { %1270 = vsyncadd (%p1667_p6), [#allocation6], 4294966784  ;;  %426 = vmatprep.mubr.bf16.mxu0 %v1295_v0  ;;  %406 = vmatprep.subr.bf16.mxu0 %v1133_v1  ;;  %v1136_v3 = vld [vmem:[#allocation5 + $0x4] ss:$8 sps:$4 sm:$0xff]   ;;  %v1138_v4 = vld [vmem:[#allocation5] ss:$8 sps:$4 sm:$0xff]  }
  0x4d   : > { %v364_v5 = vld [vmem:[%s324_s29] sm:$0xff]  ;;  %407 = vmatpush1.bf16.msra.mxu0 %v1135_v2  ;;  %v1140_v7 = vld [vmem:[%s1638_s3 + $0x38] sm:$0xff]   ;;  %1002 = vmatprep.subr.bf16.mxu1 %v1139_v6  ;;  %v1141_v8 = vld [vmem:[%s1638_s3 + $0x70] sm:$0xff]   ;;  %vm390_vm0 = vcmask 261120   ;;  %v1296_v24 = vmov 0.0   ;;  %v451_v33 = vshrl.u32 %v450_v31, 7 }
  0x4e   : > { %408 = vmatprep.subr.bf16.mxu0 %v1136_v3  ;;  %v365_v9 = vpack.c.bf16 %v364_v5, %v364_v5  ;;  %1003 = vmatpush3.bf16.msra.mxu1 %v1140_v7  ;;  %v1142_v10 = vld [vmem:[%s1638_s3 + $0x30] sm:$0xff]   ;;  %v1143_v11 = vld [vmem:[%s1638_s3 + $0x68] sm:$0xff]   ;;  %v1145_v13 = vld [vmem:[%s1638_s3 + $0x60] sm:$0xff]   ;;  %v1297_v29 = vmov 1966171168   ;;  %vm1298_vm1 = vmmov 0  }
  0x4f   : > { %1004 = vmatprep.subr.bf16.mxu1 %v1141_v8  ;;  %v1144_v12 = vld [vmem:[%s1638_s3 + $0x28] sm:$0xff]   ;;  %v1146_v14 = vld [vmem:[%s1638_s3 + $0x20] sm:$0xff]   ;;  %v1147_v15 = vld [vmem:[%s1638_s3 + $0x58] sm:$0xff]   ;;  %v448_v30 = vunpack.c.l.s4 %v1297_v29  ;;  %v466_v40 = vsub.s32 0, %v451_v33  ;;  %vm812_vm2 = vcmask 523264   ;;  %s999_s20 = sshll.u32 %s1371_s13, 7 }
  0x50   : > { %v1148_v16 = vld [vmem:[%s1638_s3 + $0x18] sm:$0xff]   ;;  %v1149_v17 = vld [vmem:[%s1638_s3 + $0x50] sm:$0xff]   ;;  %v1151_v19 = vld [vmem:[%s1638_s3 + $0x48] sm:$0xff]   ;;  %s362_s21 = scalar_lea.vmem [#allocation7], %s959_s16  ;;  %vm856_vm3 = vcmask 80896   ;;  %s1592_s29 = scalar_lea.hbm %s1644_s9, %s999_s20 }
  0x51   : > { %409 = vmatpush1.bf16.msra.mxu0 %v1138_v4  ;;  %v1150_v18 = vld [vmem:[%s1638_s3 + $0x10] sm:$0xff]   ;;  %v1152_v20 = vld [vmem:[%s1638_s3 + $0x8] sm:$0xff]   ;;  %v1153_v21 = vld [vmem:[%s1638_s3 + $0x40] sm:$0xff]   ;;  %v449_v32 = vunpack.c.0.s8 %v448_v30  ;;  %s872_s19 = sshll.u32 %s362_s21, 4  ;;  %s859_s13 = scalar_lea.sflag [#allocation4], %s1457_s26  ;;  %s1594_s19 = int_to_ptr.vmem [resolvable:$true] %s872_s19 }
  0x52   : > { %1005 = vmatpush3.bf16.msra.mxu1 %v1142_v10  ;;  %v1154_v22 = vld [vmem:[%s1638_s3] sm:$0xff]   ;;  %v1155_v23 = vld [vmem:[%s1640_s5 + $0x38] sm:$0xff]   ;;  %1038 = vmatprep.subr.bf16.mxu0 %v1296_v24  ;;  %v1156_v25 = vld [vmem:[%s1640_s5 + $0x30] sm:$0xff]   ;;  %s1221_s17 = scalar_lea.vmem %s1594_s19, 128  ;;  %p1668_p3 = scmp.ne.s32.totalorder %s1662_s14, 0 }
  0x53   : > { %1006 = vmatprep.subr.bf16.mxu1 %v1143_v11  ;;  %v1157_v26 = vld [vmem:[%s1640_s5 + $0x28] sm:$0xff]   ;;  %v1158_v27 = vld [vmem:[%s1640_s5 + $0x20] sm:$0xff]   ;;  %v1159_v28 = vld [vmem:[%s1640_s5 + $0x18] sm:$0xff]   ;;  %v452_v35 = vsub.s32 %v449_v32, %v451_v33  ;;  %p1222_p8 = scmp.ne.s32.totalorder %s1594_s19, %s1221_s17  ;;  %s1299_s16 = smov [#allocation7]  }
  0x54   : > { %966 = vmatmul.mubr.msk.bf16.vlgmr.msra.gmra.mxu0 %vm390_vm0, %v365_v9  ;;  %v967_v34 = vld.sshfl [vmem:[%s1637_s2] sm:$0x11 pattern:$0x75316420]  ;;  %v1160_v54 = vld [vmem:[%s1640_s5 + $0x10] sm:$0xff]   ;;  %v1161_v55 = vld [vmem:[%s1640_s5 + $0x8] sm:$0xff]  }
  0x55   : > { %1039 = vmatpush3.bf16.msra.mxu0 %v1155_v23  ;;  %v446_v36 = vcombine.high %v967_v34, %v967_v34  ;;  %v453_v37 = vrot.slane %v967_v34, %v452_v35  ;;  %v1162_v56 = vld [vmem:[%s1640_s5] sm:$0xff]   ;;  %1054 = vmatprep.mubr.msk.bf16.mxu0 %vm1298_vm1, %v1296_v24  ;;  %v1163_v57 = vld [vmem:[%s1642_s7 + $0x18] sm:$0xff]   ;;  %v1164_v58 = vld [vmem:[%s1642_s7 + $0x10] sm:$0xff]   ;;  %p1223_p11 = pnand %p1222_p8, %p1668_p3  ;;  %s1225_s27 = sshll.u32 %s1299_s16, 4  ;;  %s1226_s27 = int_to_ptr.vmem [resolvable:$false] %s1225_s27 }
  0x56   : > { %1007 = vmatpush3.bf16.msra.mxu1 %v1144_v12  ;;  %1040 = vmatprep.subr.bf16.mxu0 %v1296_v24  ;;  %v648_v59 = vld [vmem:[%s1639_s4] sm:$0x1]  ;;  %v1165_v7 = vld [vmem:[%s1642_s7 + $0x8] sm:$0xff]   ;;  %s1227_s15 = scalar_lea.vmem %s1226_s27, 256  ;;  %p1228_p10 = scmp.lt.s32.totalorder %s1594_s19, %s1226_s27 }
  0x57   : > { %1008 = vmatprep.subr.bf16.mxu1 %v1145_v13  ;;  %v460_v38 = vrot.slane %v446_v36, %v452_v35  ;;  %v462_v39 = vpack.i.b16 %v453_v37, %v453_v37  ;;  %v650_v60 = vpack.i.b16 %v648_v59, %v648_v59  ;;  %v1166_v8 = vld [vmem:[%s1642_s7] sm:$0xff]   ;;  %p1224_p7 = pneg %p1223_p11  ;;  %p1229_p2 = scmp.lt.s32.totalorder %s1227_s15, %s1221_s17 }
  0x58   : > { %v763_v9 = vld [vmem:[%s1641_s6] sm:$0x1] }
  0x59   : > { %1041 = vmatpush3.bf16.msra.mxu0 %v1156_v25  ;;  %v469_v41 = vpack.i.b16 %v460_v38, %v460_v38  ;;  %v467_v43 = vrot.slane %v462_v39, %v466_v40  ;;  %v655_v1 = vrot.slane %v650_v60, %v466_v40  ;;  %v765_v10 = vpack.i.b16 %v763_v9, %v763_v9  ;;  %p1230_p13 = por %p1229_p2, %p1228_p10 }
  0x5a   : > { %1009 = vmatpush3.bf16.msra.mxu1 %v1146_v14  ;;  %1042 = vmatprep.subr.bf16.mxu0 %v1296_v24 }
  0x5b   : > { %1010 = vmatprep.subr.bf16.mxu1 %v1147_v15  ;;  %v474_v45 = vrot.slane %v469_v41, %v466_v40  ;;  %v770_v11 = vrot.slane %v765_v10, %v466_v40  ;;  %p1231_p0 = pnand %p1230_p13, %p1224_p7 }
  0x5d   : > { %1043 = vmatpush3.bf16.msra.mxu0 %v1157_v26 }
  0x5e   : > { %1011 = vmatpush3.bf16.msra.mxu1 %v1148_v16  ;;  %1044 = vmatprep.subr.bf16.mxu0 %v1296_v24 }
  0x5f   : > { %1012 = vmatprep.subr.bf16.mxu1 %v1149_v17 }
  0x61   : > { %1045 = vmatpush3.bf16.msra.mxu0 %v1158_v27 }
  0x62   : > { %1013 = vmatpush3.bf16.msra.mxu1 %v1150_v18  ;;  %1046 = vmatprep.subr.bf16.mxu0 %v1296_v24 }
  0x63   : > { %1014 = vmatprep.subr.bf16.mxu1 %v1151_v19  ;;  %v992_v19 = vld [vmem:[%s1643_s8] ss:$0 sm:$0xff] }
  0x65   : > { %1047 = vmatpush3.bf16.msra.mxu0 %v1159_v28 }
  0x66   : > { %1015 = vmatpush3.bf16.msra.mxu1 %v1152_v20  ;;  %1048 = vmatprep.subr.bf16.mxu0 %v1296_v24 }
  0x67   : > { %1016 = vmatprep.subr.bf16.mxu1 %v1153_v21 }
  0x69   : > { %1049 = vmatpush3.bf16.msra.mxu0 %v1160_v54 }
  0x6a   : > { %1017 = vmatpush3.bf16.msra.mxu1 %v1154_v22  ;;  %1050 = vmatprep.subr.bf16.mxu0 %v1296_v24 }
  0x6b   : > { %1058 = vmatprep.subr.bf16.mxu1 %v1296_v24 }
  0x6d   : > { %1051 = vmatpush3.bf16.msra.mxu0 %v1161_v55 }
  0x6e   : > { %1052 = vmatprep.subr.bf16.mxu0 %v1296_v24 }
  0x71   : > { %1053 = vmatpush3.bf16.msra.mxu0 %v1162_v56 }
 0x114   : > { %v428_v42 = vpop.f32.mrf.mxu0 }
 0x115   : > { %v435_v44 = vpack.c.bf16 %v428_v42, %v428_v42 }
 0x116   : > { %v430_v46 = vpop.f32.mrf.mxu0 }
 0x117   : > { %v436_v47 = vpack.c.bf16 %v430_v46, %v430_v46  ;;  %v475_v48 = vadd.bf16 %v467_v43, %v435_v44 }
 0x118   : > { %v432_v49 = vpop.f32.mrf.mxu0 }
 0x119   : > { %v476_v50 = vadd.bf16 %v474_v45, %v436_v47  ;;  %v477_v53 = vmax.bf16 %v1295_v0, %v475_v48 }
 0x11a   : > { %v433_v51 = vpop.f32.mrf.mxu0 }
 0x11b   : > { %v478_v52 = vmax.bf16 %v1295_v0, %v476_v50 }
 0x11d   : > { %639 = vmatprep.mubr.bf16.mxu1 %v478_v52 }
 0x11e   : > { %640 = vmatmul.mubr.bf16.vlgmr.msra.gmra.mxu1 %v477_v53 }
 0x11f   : > { %1066 = vmatprep.mubr.msk.bf16.mxu1 %vm1298_vm1, %v1296_v24  ;;  %1059 = vmatpush3.bf16.msra.mxu1 %v1163_v57 }
 0x120   : > { %1060 = vmatprep.subr.bf16.mxu1 %v1296_v24 }
 0x123   : > { %1061 = vmatpush3.bf16.msra.mxu1 %v1164_v58 }
 0x124   : > { %1062 = vmatprep.subr.bf16.mxu1 %v1296_v24 }
 0x127   : > { %1063 = vmatpush3.bf16.msra.mxu1 %v1165_v7 }
 0x128   : > { %1064 = vmatprep.subr.bf16.mxu1 %v1296_v24 }
 0x12b   : > { %1065 = vmatpush3.bf16.msra.mxu1 %v1166_v8 }
 0x1de   : > { %v1018_v61 = vpop.f32.mrf.mxu1 }
 0x1e0   : > { %v1019_v62 = vpop.f32.mrf.mxu1 }
 0x1e1   : > { %v1020_v63 = vadd.f32 %v1019_v62, %v1018_v61 }
 0x1e2   : > { %v1021_v2 = vpop.f32.mrf.mxu1 }
 0x1e3   : > { %v647_v3 = vpack.c.bf16 %v1020_v63, %v1020_v63 }
 0x1e4   : > { %v1022_v4 = vpop.f32.mrf.mxu1 }
 0x1e5   : > { %v656_v5 = vadd.bf16 %v655_v1, %v647_v3 }
 0x1e7   : > { %v657_v6 = vmax.bf16 %v1295_v0, %v656_v5 }
 0x1e9   : > { %1055 = vmatmul.mubr.bf16.vlgmr.msra.gmra.mxu0 %v657_v6 }
 0x2a9   : > { %v756_v12 = vpop.f32.mrf.mxu0 }
 0x2aa   : > { %v762_v13 = vpack.c.bf16 %v756_v12, %v756_v12 }
 0x2ab   : > { %v1056_v14 = vpop.f32.mrf.mxu0 }
 0x2ac   : > { %v771_v15 = vadd.bf16 %v770_v11, %v762_v13 }
 0x2ad   : > { %v759_v16 = vpop.f32.mrf.mxu0 }
 0x2ae   : > { %v772_v17 = vmax.bf16 %v1295_v0, %v771_v15 }
 0x2af   : > { %v1057_v18 = vpop.f32.mrf.mxu0 }
 0x2b0   : > { %1067 = vmatmul.mubr.msk.bf16.vlgmr.msra.gmra.mxu1 %vm812_vm2, %v772_v17 }
 0x370   : > { %v850_v20 = vpop.f32.mrf.mxu1 }
 0x371   : > { %v851_v21 = vadd.f32 %v992_v19, %v850_v20 }
 0x372   : > { %v1068_v0 = vpop.f32.mrf.mxu1 }
 0x373   : > { %857 = vst.msk [vmem:[%s362_s21] sm:$0xff] %vm856_vm3, %v851_v21 }
 0x374   : > { %v853_v22 = vpop.f32.mrf.mxu1 }
 0x375   : > { %1234 = shalt.err (!%p1231_p0)
}
 0x376   : > { %s1235_s22 = scalar_lea.hbm %s1592_s29, 128  ;;  %s1239_s25 = scalar_lea.hbm %s1644_s9, 256 }
 0x377   : > { %p1236_p5 = scmp.ne.s32.totalorder %s1592_s29, %s1235_s22  ;;  %p1240_p1 = scmp.lt.s32.totalorder %s1592_s29, %s1644_s9 }
 0x378   : > { %p1241_p4 = scmp.lt.s32.totalorder %s1239_s25, %s1235_s22 }
 0x379   : > { %p1237_p9 = pnand %p1236_p5, %p1668_p3 }
 0x37a   : > { %p1242_p6 = por %p1241_p4, %p1240_p1 }
 0x37b   : > { %p1238_p12 = pneg %p1237_p9 }
 0x37d   : > { %p1243_p8 = pnand %p1242_p6, %p1238_p12 }
 0x37f   : > { %1246 = shalt.err (!%p1243_p8)
}
 0x380   : > { %1076 = dma.vmem_to_hbm [thread:$0]  (%p1668_p3), %s1594_s19, 128, %s1592_s29, %s859_s13   ;;  %v1069_v23 = vpop.f32.mrf.mxu1 }
 0x381 PF: > { %s1669_s20 = sld [smem:[#allocation11_spill]]  ;;  %s884_s21 = sand.u32 1, %s1277_s30  }
 0x382   : > { %p1671_p7 = scmp.ge.s32.totalorder %s1289_s12, 2  ;;  %s885_s18 = scalar_lea.sflag [#allocation4], %s884_s21 }
 0x387   : > { %p1670_p11 = scmp.ne.s32.totalorder %s1669_s20, 0 }
 0x389   : > { %p1087_p10 = pnand %p1671_p7, %p1670_p11 }
 0x38b   : > { %p1088_p2 = pneg %p1087_p10 }
 0x38d   : > { %1272 = dma.done.wait (%p1088_p2), %s885_s18, 128  }
 0x38e   : > { %1274 = vsyncadd (%p1088_p2), %s885_s18, 4294967168  ;;  %s1672_s12 = sld [smem:[#allocation12_spill]]  ;;  %s1674_s30 = smov %s1281_s10 }
 0x38f   : > { %s1673_s14 = sld [smem:[#allocation13_spill]]  ;;  %s1675_s10 = smov %s1285_s11 }
 0x394   : > { %p23_p13 = scmp.ge.s32.totalorder %s1672_s12, 4  }
 0x395   : > { %s1676_s11 = smov %s1673_s14 }
 0x396   :  { %25 = sbr.rel (!%p23_p13) target bundleno = 8 (0x8), region = 105 }
 0x39b   :  { %890 = vsyncpa [#allocation3], 1 }
 0x39c   :  { %892 = vsyncpa [#allocation3 + $0x1], 1 }
 0x39d   :  { %893 = vsyncpa [#allocation6], 1 }
 0x39e   :  { %894 = vsyncpa [#allocation4], 1 }
 0x39f   :  { %896 = vsyncpa [#allocation4 + $0x1], 1 }

</bundles_post_ra>
